<compile_context>
chip_gen: v5e
topology: v5e:2x2
jax: 0.10.0
libtpu: 0.0.40
codegen_flags: <defaults>
</compile_context>

<pallas_src>
import functools

import jax
import jax.numpy as jnp
from jax.experimental import pallas as pl
from jax.experimental.pallas import tpu as pltpu


def mmdl_kernel(x_ref, w_enc_ref, b_enc_ref, w_head_ref, b_head_ref, out_ref):
    """One batch tile: packed encoder matmul + ReLU, then head matmul + bias."""
    # Packed encoders: x:(TM, D1+D2) @ blockdiag(w1,w2):(D1+D2, 2H) -> (TM, 2H)
    h = jnp.dot(x_ref[...], w_enc_ref[...], preferred_element_type=jnp.float32)
    h = jnp.maximum(h + b_enc_ref[...], 0.0)                 # bias + ReLU in f32
    # Head on the (implicitly concatenated) representation:
    # (TM, 2H) @ (2H, C) -> (TM, C).
    h = h.astype(w_head_ref.dtype)
    out = jnp.dot(h, w_head_ref[...], preferred_element_type=jnp.float32)
    out_ref[...] = out + b_head_ref[...]


@functools.partial(jax.jit, static_argnames=("compute_dtype", "block_b"))
def multi_framework_forward(x1, x2, params, *, compute_dtype=jnp.float32,
                            block_b=512):
    """MMDL forward.  x1:(B,D1), x2:(B,D2) -> logits (B,C)."""
    w1, b1, w2, b2, wh, bh = (params["w1"], params["b1"], params["w2"],
                              params["b2"], params["wh"], params["bh"])
    B, D1 = x1.shape
    D2 = x2.shape[1]
    H = w1.shape[1]
    C = wh.shape[1]
    D = D1 + D2
    H2 = 2 * H

    # --- trace-time parameter packing (weights are static; one-time cost) ---
    # Block-diagonal encoder weight: concat(x1,x2) @ W_enc == [x1@w1 | x2@w2].
    w_enc = jnp.zeros((D, H2), dtype=jnp.float32)
    w_enc = w_enc.at[:D1, :H].set(w1.astype(jnp.float32))
    w_enc = w_enc.at[D1:, H:].set(w2.astype(jnp.float32))
    b_enc = jnp.concatenate([b1, b2]).astype(jnp.float32).reshape(1, H2)
    w_head = wh.astype(jnp.float32)
    b_head = bh.astype(jnp.float32).reshape(1, C)

    # MXU inputs in compute_dtype (bf16 on v6e/v7x for 2x MXU + half DMA bytes);
    # biases stay f32 and are added after the f32-accumulated dot.
    x = jnp.concatenate([x1, x2], axis=-1).astype(compute_dtype)
    w_enc = w_enc.astype(compute_dtype)
    w_head = w_head.astype(compute_dtype)

    # --- batch tiling ---
    if B <= block_b:
        TM = B                                    # full extent (always legal)
    else:
        TM = (block_b // 8) * 8                   # sublane-aligned batch tile
    grid = (pl.cdiv(B, TM),)

    # --- explicit VMEM budget: double-buffered blocks + resident weights ---
    # (lane-pad to 128 / sublane-pad to 8 for the estimate, matching VMEM layout)
    lane = 128
    d_pad = pl.cdiv(D, lane) * lane
    h2_pad = pl.cdiv(H2, lane) * lane
    c_pad = pl.cdiv(C, lane) * lane
    in_bytes = jnp.dtype(compute_dtype).itemsize
    need = (2 * TM * d_pad * in_bytes             # x block (double-buffered)
            + 2 * TM * c_pad * 4                  # out block (double-buffered)
            + (D * h2_pad + H2 * c_pad) * in_bytes  # resident weights
            + 8 * (h2_pad + c_pad) * 4)           # biases (sublane-padded)
    vmem_limit = int(min(max(2 * need, 16 << 20), 48 << 20))

    in_specs = [
        pl.BlockSpec((TM, D), lambda i: (i, 0)),       # activations: tiled on batch
        pl.BlockSpec((D, H2), lambda i: (0, 0)),       # weights: resident
        pl.BlockSpec((1, H2), lambda i: (0, 0)),
        pl.BlockSpec((H2, C), lambda i: (0, 0)),
        pl.BlockSpec((1, C), lambda i: (0, 0)),
    ]
    out_specs = pl.BlockSpec((TM, C), lambda i: (i, 0))

    return pl.pallas_call(
        mmdl_kernel,
        out_shape=jax.ShapeDtypeStruct((B, C), jnp.float32),
        grid=grid,
        in_specs=in_specs,
        out_specs=out_specs,
        compiler_params=pltpu.CompilerParams(
            dimension_semantics=("parallel",),    # shard batch across TCs (v7x)
            vmem_limit_bytes=vmem_limit,
        ),
    )(x, w_enc, b_enc, w_head, b_head)


def multi_framework_ref(x1, x2, params):
    """Pure-JAX reference matching the PyTorch MultiFramework semantics."""
    h1 = jnp.maximum(x1 @ params["w1"] + params["b1"], 0.0)   # encoder 0
    h2 = jnp.maximum(x2 @ params["w2"] + params["b2"], 0.0)   # encoder 1
    fused = jnp.concatenate([h1, h2], axis=-1)                # Concat fusion
    return fused @ params["wh"] + params["bh"]                # head
# TODO(synk): the module's self.reps / self.fuseout bookkeeping (stored
# intermediate activations) is training-time state and is not materialized
# by this inference kernel.


if __name__ == "__main__":
    # Small shapes consistent with the module's forward.
    B, D1, D2, H, C = 8, 16, 32, 32, 8

    key = jax.random.PRNGKey(0)
    k = jax.random.split(key, 8)
    x1 = jax.random.normal(k[0], (B, D1), dtype=jnp.float32)
    x2 = jax.random.normal(k[1], (B, D2), dtype=jnp.float32)

    params = {
        "w1": jax.random.normal(k[2], (D1, H), dtype=jnp.float32) * 0.1,
        "b1": jax.random.normal(k[3], (H,), dtype=jnp.float32) * 0.1,
        "w2": jax.random.normal(k[4], (D2, H), dtype=jnp.float32) * 0.1,
        "b2": jax.random.normal(k[5], (H,), dtype=jnp.float32) * 0.1,
        "wh": jax.random.normal(k[6], (2 * H, C), dtype=jnp.float32) * 0.1,
        "bh": jax.random.normal(k[7], (C,), dtype=jnp.float32) * 0.1,
    }

    ref = multi_framework_ref(x1, x2, params)

    # f32 path: exact match against the reference.
    out = multi_framework_forward(x1, x2, params, compute_dtype=jnp.float32)
    out = jax.block_until_ready(out)
    assert out.shape == (B, C)
    assert jnp.allclose(out, ref, atol=1e-5, rtol=1e-5), "f32 mismatch vs reference"

    # bf16 MXU path (v6e/v7x throughput lever): f32 accumulation, looser tol.
    out_bf16 = multi_framework_forward(x1, x2, params, compute_dtype=jnp.bfloat16)
    out_bf16 = jax.block_until_ready(out_bf16)
    assert out_bf16.shape == (B, C)
    assert jnp.allclose(out_bf16, ref, atol=3e-2, rtol=3e-2), "bf16 mismatch vs reference"

    print("KERNEL_OK")
</pallas_src>

<mosaic_0001>
module attributes {stable_mosaic.version = 11 : i64} {
  func.func @mmdl_kernel(%arg0: i32, %arg1: memref<8x48xf32, #tpu.memory_space<vmem>>, %arg2: memref<48x64xf32, #tpu.memory_space<vmem>>, %arg3: memref<1x64xf32, #tpu.memory_space<vmem>>, %arg4: memref<64x8xf32, #tpu.memory_space<vmem>>, %arg5: memref<1x8xf32, #tpu.memory_space<vmem>>, %arg6: memref<8x8xf32, #tpu.memory_space<vmem>>) attributes {dimension_semantics = [#tpu.dimension_semantics<parallel>], iteration_bounds = array<i64: 1>, scalar_prefetch = 0 : i64, scratch_operands = 0 : i64, tpu.core_type = #tpu.core_type<tc>, window_params = [{transform_indices = @transform_0, window_bounds = array<i64: 8, 48>}, {pipeline_mode = #tpu.pipeline_mode<synchronous>, transform_indices = @transform_1, window_bounds = array<i64: 48, 64>}, {pipeline_mode = #tpu.pipeline_mode<synchronous>, transform_indices = @transform_2, window_bounds = array<i64: 1, 64>}, {pipeline_mode = #tpu.pipeline_mode<synchronous>, transform_indices = @transform_3, window_bounds = array<i64: 64, 8>}, {pipeline_mode = #tpu.pipeline_mode<synchronous>, transform_indices = @transform_4, window_bounds = array<i64: 1, 8>}, {transform_indices = @transform_5, window_bounds = array<i64: 8, 8>}]} {
    %c0 = arith.constant 0 : index
    %c0_0 = arith.constant 0 : index
    %0 = vector.load %arg1[%c0, %c0_0] : memref<8x48xf32, #tpu.memory_space<vmem>>, vector<8x48xf32>
    %c0_1 = arith.constant 0 : index
    %c0_2 = arith.constant 0 : index
    %1 = vector.load %arg2[%c0_1, %c0_2] : memref<48x64xf32, #tpu.memory_space<vmem>>, vector<48x64xf32>
    %cst = arith.constant dense<0.000000e+00> : vector<8x64xf32>
    %2 = tpu.matmul %0, %1, %cst {dimension_numbers = #tpu.dot_dimension_numbers<[1], [0], [0], [1], [0, 0, 1, 1], [], []>} : vector<8x48xf32>, vector<48x64xf32>, vector<8x64xf32> -> vector<8x64xf32>
    %c0_3 = arith.constant 0 : index
    %c0_4 = arith.constant 0 : index
    %3 = vector.load %arg3[%c0_3, %c0_4] : memref<1x64xf32, #tpu.memory_space<vmem>>, vector<1x64xf32>
    %4 = vector.broadcast %3 : vector<1x64xf32> to vector<8x64xf32>
    %5 = arith.addf %2, %4 : vector<8x64xf32>
    %cst_5 = arith.constant 0.000000e+00 : f32
    %6 = vector.broadcast %cst_5 : f32 to vector<8x64xf32>
    %7 = arith.maximumf %5, %6 : vector<8x64xf32>
    %c0_6 = arith.constant 0 : index
    %c0_7 = arith.constant 0 : index
    %8 = vector.load %arg4[%c0_6, %c0_7] : memref<64x8xf32, #tpu.memory_space<vmem>>, vector<64x8xf32>
    %cst_8 = arith.constant dense<0.000000e+00> : vector<8x8xf32>
    %9 = tpu.matmul %7, %8, %cst_8 {dimension_numbers = #tpu.dot_dimension_numbers<[1], [0], [0], [1], [0, 0, 1, 1], [], []>} : vector<8x64xf32>, vector<64x8xf32>, vector<8x8xf32> -> vector<8x8xf32>
    %c0_9 = arith.constant 0 : index
    %c0_10 = arith.constant 0 : index
    %10 = vector.load %arg5[%c0_9, %c0_10] : memref<1x8xf32, #tpu.memory_space<vmem>>, vector<1x8xf32>
    %11 = vector.broadcast %10 : vector<1x8xf32> to vector<8x8xf32>
    %12 = arith.addf %9, %11 : vector<8x8xf32>
    %c0_11 = arith.constant 0 : index
    %c0_12 = arith.constant 0 : index
    %13 = vector.load %arg6[%c0_11, %c0_12] : memref<8x8xf32, #tpu.memory_space<vmem>>, vector<8x8xf32>
    tpu.vector_store %arg6[%c0_11, %c0_12], %12 {strides = array<i32>} : memref<8x8xf32, #tpu.memory_space<vmem>>, vector<8x8xf32>,
    return
  }
  func.func @transform_0(%arg0: i32) -> (i32, i32) {
    %c0_i32 = arith.constant 0 : i32
    %c0_i32_0 = arith.constant 0 : i32
    return %arg0, %c0_i32 : i32, i32
  }
  func.func @transform_1(%arg0: i32) -> (i32, i32) {
    %c0_i32 = arith.constant 0 : i32
    %c0_i32_0 = arith.constant 0 : i32
    %c0_i32_1 = arith.constant 0 : i32
    return %c0_i32, %c0_i32_0 : i32, i32
  }
  func.func @transform_2(%arg0: i32) -> (i32, i32) {
    %c0_i32 = arith.constant 0 : i32
    %c0_i32_0 = arith.constant 0 : i32
    %c0_i32_1 = arith.constant 0 : i32
    return %c0_i32, %c0_i32_0 : i32, i32
  }
  func.func @transform_3(%arg0: i32) -> (i32, i32) {
    %c0_i32 = arith.constant 0 : i32
    %c0_i32_0 = arith.constant 0 : i32
    %c0_i32_1 = arith.constant 0 : i32
    return %c0_i32, %c0_i32_0 : i32, i32
  }
  func.func @transform_4(%arg0: i32) -> (i32, i32) {
    %c0_i32 = arith.constant 0 : i32
    %c0_i32_0 = arith.constant 0 : i32
    %c0_i32_1 = arith.constant 0 : i32
    return %c0_i32, %c0_i32_0 : i32, i32
  }
  func.func @transform_5(%arg0: i32) -> (i32, i32) {
    %c0_i32 = arith.constant 0 : i32
    %c0_i32_0 = arith.constant 0 : i32
    return %arg0, %c0_i32 : i32, i32
  }
}

</mosaic_0001>

<bundles_post_ra>
// kernel: multi_framework_forward.1
= control target key start
LH: loop header
LB: loop body
LE: loop exit
PB: predicated region body
PF: predicated region fallthrough
CT: control target
= control target key end

     0   :  { %s227_s0 = inlined_call_operand.vmem [shape: f32[8,48], index: 0, kind: input, shape index: {}]   ;;  %s228_s1 = inlined_call_operand.vmem [shape: f32[48,64], index: 1, kind: input, shape index: {}]   ;;  %s229_s2 = inlined_call_operand.vmem [shape: f32[1,64], index: 2, kind: input, shape index: {}]   ;;  %s230_s3 = inlined_call_operand.vmem [shape: f32[64,8], index: 3, kind: input, shape index: {}]   ;;  %s231_s4 = inlined_call_operand.vmem [shape: f32[1,8], index: 4, kind: input, shape index: {}]   ;;  %s232_s5 = inlined_call_operand.hbm [shape: f32[8,8], index: 5, kind: output, shape index: {}]  }
   0x1   :  { %v27_v0 = vld [vmem:[%s228_s1 + $0x28] sm:$0xff]  ;;  %v26_v1 = vld [vmem:[%s228_s1 + $0x20] sm:$0xff]  ;;  %v25_v2 = vld [vmem:[%s228_s1 + $0x18] sm:$0xff] }
   0x2   :  { %46 = vmatpush.msra.mxu0 %v27_v0  ;;  %v64_v3 = vld [vmem:[%s230_s3 + $0x38] sm:$0xff]  ;;  %v63_v4 = vld [vmem:[%s230_s3 + $0x30] sm:$0xff]  ;;  %v62_v6 = vld [vmem:[%s230_s3 + $0x28] sm:$0xff] }
   0x3   :  { %v24_v5 = vld [vmem:[%s228_s1 + $0x10] sm:$0xff]  ;;  %81 = vmatpush.msra.mxu1 %v64_v3 }
   0x4   :  { %47 = vmatpush.msra.mxu0 %v26_v1 }
   0x5   :  { %82 = vmatpush.msra.mxu1 %v63_v4 }
   0x6   :  { %48 = vmatpush.msra.mxu0 %v25_v2 }
   0x7   :  { %10 = vsyncpa [#allocation3], 0  ;;  %v23_v7 = vld [vmem:[%s228_s1 + $0x8] sm:$0xff]  ;;  %v61_v8 = vld [vmem:[%s230_s3 + $0x20] sm:$0xff]  ;;  %83 = vmatpush.msra.mxu1 %v62_v6  ;;  %vm32_vm0 = vcmask 392192   ;;  %vm69_vm1 = vcmask 523264  }
   0x8   :  { %49 = vmatpush.msra.mxu0 %v24_v5  ;;  %v22_v9 = vld [vmem:[%s228_s1] sm:$0xff]  ;;  %v60_v10 = vld [vmem:[%s230_s3 + $0x18] sm:$0xff]  ;;  %v59_v12 = vld [vmem:[%s230_s3 + $0x10] sm:$0xff]  ;;  %s142_s25 = smov [#allocation2]   ;;  %vm93_vm2 = vcmask 64512  }
   0x9   :  { %v21_v11 = vld [vmem:[%s227_s0] sm:$0xff]  ;;  %84 = vmatpush.msra.mxu1 %v61_v8  ;;  %v58_v13 = vld [vmem:[%s230_s3 + $0x8] sm:$0xff]  ;;  %s100_s26 = sshll.u32 %s142_s25, 4  ;;  %s101_s26 = int_to_ptr.vmem [resolvable:$true] %s100_s26 }
   0xa   :  { %50 = vmatpush.msra.mxu0 %v23_v7  ;;  %v57_v14 = vld [vmem:[%s230_s3] sm:$0xff]  ;;  %s102_s3 = sshll.u32 %s232_s5, 4  ;;  %s103_s3 = int_to_ptr.hbm [resolvable:$true] %s102_s3 }
   0xb   :  { %85 = vmatpush.msra.mxu1 %v60_v10  ;;  %v114_v15 = vld [vmem:[%s229_s2] ss:$0 sm:$0xff] }
   0xc   :  { %51 = vmatpush.msra.mxu0 %v22_v9  ;;  %v115_v19 = vld [vmem:[%s231_s4] ss:$0 sm:$0xff] }
   0xd   :  { %111 = vmatmul.msk.f32.vlgmr.msra.gmra.mxu0 %vm32_vm0, %v21_v11  ;;  %86 = vmatpush.msra.mxu1 %v59_v12 }
   0xf   :  { %87 = vmatpush.msra.mxu1 %v58_v13 }
  0x11   :  { %88 = vmatpush.msra.mxu1 %v57_v14 }
  0x8a   :  { %v53_v16 = vpop.f32.mrf.mxu0 }
  0x8b   :  { %v54_v17 = vadd.f32 %v114_v15, %v53_v16 }
  0x8d   :  { %v56_v18 = vmax.f32 %v54_v17, 0.0 }
  0x8f   :  { %112 = vmatmul.msk.f32.vlgmr.msra.gmra.mxu1 %vm69_vm1, %v56_v18 }
 0x10c   :  { %v90_v20 = vpop.f32.mrf.mxu1 }
 0x10d   :  { %v91_v21 = vadd.f32 %v115_v19, %v90_v20 }
 0x10f   :  { %94 = vst.msk [vmem:[#allocation2] sm:$0xff] %vm93_vm2, %v91_v21 }
 0x110   :  { %105 = dma.vmem_to_hbm [thread:$0]  %s101_s26, 128, %s103_s3, [#allocation3]  }
 0x111   :  { %140 = dma.done.wait [#allocation3], 128  }
 0x112   :  { %141 = vsyncadd [#allocation3], 4294967168 }
 0x113   :  { %110 = vsyncpa [#allocation3], 1 }

</bundles_post_ra>
